<compile_context>
chip_gen: v7x
topology: tpu7x:2x2x1
jax: 0.10.0
libtpu: 0.0.40
codegen_flags: <defaults>
</compile_context>

<pallas_src>
import functools

import jax
import jax.numpy as jnp
from jax import lax
from jax.experimental import pallas as pl
from jax.experimental.pallas import tpu as pltpu


def _irmse_kernel(pred_ref, target_ref, sum_out_ref, cnt_out_ref,
                  sum_acc, cnt_acc, *, n_valid):
    p = pl.program_id(0)          # core-split axis ("parallel")
    j = pl.program_id(1)          # reduction axis over row tiles ("arbitrary")
    k_steps = pl.num_programs(1)

    @pl.when(j == 0)
    def _():
        sum_acc[...] = jnp.zeros_like(sum_acc)
        cnt_acc[...] = jnp.zeros_like(cnt_acc)

    tile_rows, lane = pred_ref.shape
    t = target_ref[...].astype(jnp.float32)
    pr = pred_ref[...].astype(jnp.float32)

    # Global element index of every slot in this tile; masks both the padded
    # tail of the last real tile and any phantom (clamped) tiles of the last
    # core, as well as undefined data in partially out-of-bounds blocks.
    tile_idx = p * k_steps + j
    row_ids = lax.broadcasted_iota(jnp.int32, (tile_rows, lane), 0)
    lane_ids = lax.broadcasted_iota(jnp.int32, (tile_rows, lane), 1)
    gidx = (tile_idx * tile_rows + row_ids) * lane + lane_ids

    mask = (t > 0.0) & (gidx < n_valid)

    # Safe denominators only where the element is discarded by the mask;
    # where valid we reproduce PyTorch semantics (incl. inf if pred == 0).
    td = jnp.where(mask, t, 1.0)
    pd = jnp.where(mask, pr, 1.0)
    # Single divide:  1/t - 1/p == (p - t) / (t * p)
    diff = (pd - td) / (td * pd)
    sq = jnp.where(mask, diff * diff, 0.0)

    # Pure VPU elementwise accumulation (no per-step cross-lane reduction,
    # no serial scalar read-modify-write).
    sum_acc[...] += sq
    cnt_acc[...] += mask.astype(jnp.float32)

    @pl.when(j == k_steps - 1)
    def _():
        s = jnp.sum(sum_acc[...])
        c = jnp.sum(cnt_acc[...])
        # Lane-dense (1, 8, 128) per-core output blocks; wrapper reads [.., 0, 0].
        sum_out_ref[...] = jnp.broadcast_to(s, sum_out_ref.shape)
        cnt_out_ref[...] = jnp.broadcast_to(c, cnt_out_ref.shape)


def masked_irmse_loss(pred, target, *, tile_rows=2048, n_split=2):
    assert pred.ndim == target.ndim, "inconsistent dimensions"
    lane = 128
    n = pred.size  # static

    def _sublane(dt):
        return max(8, 8 * (4 // jnp.dtype(dt).itemsize))

    sub = max(_sublane(pred.dtype), _sublane(target.dtype))

    pred_f = pred.reshape(-1)
    target_f = target.reshape(-1)

    rows = -(-n // lane)
    rows_p = max(rows, sub)
    n_view = rows_p * lane
    if n_view != n:
        # TODO(synk): only hit when n is not a multiple of 128 (or tiny); this
        # path pays one HBM copy.  Padding values are irrelevant: the in-kernel
        # gidx < n mask discards them.
        pred_f = jnp.pad(pred_f, (0, n_view - n))
        target_f = jnp.pad(target_f, (0, n_view - n))

    pred2 = pred_f.reshape(rows_p, lane)
    target2 = target_f.reshape(rows_p, lane)

    # Tile size: as big as allowed, multiple of the sublane packing, <= rows_p.
    tr = max((min(tile_rows, rows_p) // sub) * sub, sub)
    t_tiles = -(-rows_p // tr)

    ns = n_split if t_tiles >= n_split else 1
    k_steps = -(-t_tiles // ns)

    def in_map(p, j):
        # Clamp so phantom tiles of the last core DMA a valid block; their
        # contribution is zeroed in-kernel via the global-index mask.
        return (jnp.minimum(p * k_steps + j, t_tiles - 1), 0)

    kernel = functools.partial(_irmse_kernel, n_valid=n)

    sums, cnts = pl.pallas_call(
        kernel,
        out_shape=(
            jax.ShapeDtypeStruct((ns, 8, lane), jnp.float32),
            jax.ShapeDtypeStruct((ns, 8, lane), jnp.float32),
        ),
        grid_spec=pltpu.PrefetchScalarGridSpec(
            num_scalar_prefetch=0,
            grid=(ns, k_steps),
            in_specs=[
                pl.BlockSpec((tr, lane), in_map),
                pl.BlockSpec((tr, lane), in_map),
            ],
            out_specs=[
                pl.BlockSpec((1, 8, lane), lambda p, j: (p, 0, 0)),
                pl.BlockSpec((1, 8, lane), lambda p, j: (p, 0, 0)),
            ],
            scratch_shapes=[
                pltpu.VMEM((tr, lane), jnp.float32),
                pltpu.VMEM((tr, lane), jnp.float32),
            ],
        ),
        compiler_params=pltpu.CompilerParams(
            dimension_semantics=("parallel", "arbitrary")),
        cost_estimate=pl.CostEstimate(
            flops=7 * n,
            transcendentals=n,
            bytes_accessed=n * (pred.dtype.itemsize + target.dtype.itemsize)
            + 2 * ns * 8 * lane * 4,
        ),
    )(pred2, target2)

    total_sum = jnp.sum(sums[:, 0, 0])
    total_cnt = jnp.sum(cnts[:, 0, 0])
    # NaN if no valid element, matching PyTorch mean-of-empty behavior.
    return jnp.sqrt(total_sum / total_cnt)


def _reference(pred, target):
    pred = pred.astype(jnp.float32)
    target = target.astype(jnp.float32)
    mask = target > 0.0
    td = jnp.where(mask, target, 1.0)
    pd = jnp.where(mask, pred, 1.0)
    diff = 1.0 / td - 1.0 / pd
    sq = jnp.where(mask, diff * diff, 0.0)
    return jnp.sqrt(jnp.sum(sq) / jnp.sum(mask.astype(jnp.float32)))


if __name__ == "__main__":
    key = jax.random.PRNGKey(0)
    k1, k2 = jax.random.split(key)

    # Primary shape (matches the module's elementwise NCHW usage).
    shape = (2, 4, 16, 16)
    target = jax.random.normal(k1, shape, dtype=jnp.float32) + 0.5
    pred = jax.random.uniform(k2, shape, dtype=jnp.float32,
                              minval=0.5, maxval=2.0)
    loss = jax.block_until_ready(masked_irmse_loss(pred, target))
    ref = jax.block_until_ready(_reference(pred, target))
    assert jnp.allclose(loss, ref, rtol=1e-5, atol=1e-6), (loss, ref)

    # Secondary shape exercising multi-step grid, dual-core split and the
    # in-kernel tail masking of a partially out-of-bounds last tile.
    shape2 = (1, 1, 120, 160)
    t2 = jax.random.normal(k1, shape2, dtype=jnp.float32) + 0.3
    p2 = jax.random.uniform(k2, shape2, dtype=jnp.float32,
                            minval=0.25, maxval=4.0)
    loss2 = jax.block_until_ready(masked_irmse_loss(p2, t2, tile_rows=64))
    ref2 = jax.block_until_ready(_reference(p2, t2))
    assert jnp.allclose(loss2, ref2, rtol=1e-5, atol=1e-6), (loss2, ref2)

    print("KERNEL_OK")
</pallas_src>

<mosaic_0001>
module attributes {stable_mosaic.version = 11 : i64} {
  func.func @_irmse_kernel(%arg0: i32, %arg1: i32, %arg2: memref<16x128xf32, #tpu.memory_space<vmem>>, %arg3: memref<16x128xf32, #tpu.memory_space<vmem>>, %arg4: memref<1x8x128xf32, #tpu.memory_space<vmem>>, %arg5: memref<1x8x128xf32, #tpu.memory_space<vmem>>, %arg6: memref<16x128xf32, #tpu.memory_space<vmem>>, %arg7: memref<16x128xf32, #tpu.memory_space<vmem>>) attributes {dimension_semantics = [#tpu.dimension_semantics<parallel>, #tpu.dimension_semantics<arbitrary>], iteration_bounds = array<i64: 1, 1>, scalar_prefetch = 0 : i64, scratch_operands = 2 : i64, tpu.core_type = #tpu.core_type<tc>, window_params = [{transform_indices = @transform_0, window_bounds = array<i64: 16, 128>}, {transform_indices = @transform_1, window_bounds = array<i64: 16, 128>}, {transform_indices = @transform_2, window_bounds = array<i64: 1, 8, 128>}, {transform_indices = @transform_3, window_bounds = array<i64: 1, 8, 128>}]} {
    %c0_i32 = arith.constant 0 : i32
    %0 = arith.cmpi eq, %arg1, %c0_i32 : i32
    %1 = arith.extui %0 : i1 to i32
    %c0_i32_0 = arith.constant 0 : i32
    %2 = arith.cmpi ne, %1, %c0_i32_0 : i32
    scf.if %2 {
      %cst_17 = arith.constant 0.000000e+00 : f32
      %41 = vector.broadcast %cst_17 : f32 to vector<16x128xf32>
      %c0_18 = arith.constant 0 : index
      %c0_19 = arith.constant 0 : index
      %42 = vector.load %arg6[%c0_18, %c0_19] : memref<16x128xf32, #tpu.memory_space<vmem>>, vector<16x128xf32>
      tpu.vector_store %arg6[%c0_18, %c0_19], %41 {strides = array<i32>} : memref<16x128xf32, #tpu.memory_space<vmem>>, vector<16x128xf32>,
      %cst_20 = arith.constant 0.000000e+00 : f32
      %43 = vector.broadcast %cst_20 : f32 to vector<16x128xf32>
      %c0_21 = arith.constant 0 : index
      %c0_22 = arith.constant 0 : index
      %44 = vector.load %arg7[%c0_21, %c0_22] : memref<16x128xf32, #tpu.memory_space<vmem>>, vector<16x128xf32>
      tpu.vector_store %arg7[%c0_21, %c0_22], %43 {strides = array<i32>} : memref<16x128xf32, #tpu.memory_space<vmem>>, vector<16x128xf32>,
    } else {
    }
    %c0 = arith.constant 0 : index
    %c0_1 = arith.constant 0 : index
    %3 = vector.load %arg3[%c0, %c0_1] : memref<16x128xf32, #tpu.memory_space<vmem>>, vector<16x128xf32>
    %c0_2 = arith.constant 0 : index
    %c0_3 = arith.constant 0 : index
    %4 = vector.load %arg2[%c0_2, %c0_3] : memref<16x128xf32, #tpu.memory_space<vmem>>, vector<16x128xf32>
    %c1_i32 = arith.constant 1 : i32
    %5 = arith.muli %arg0, %c1_i32 : i32
    %6 = arith.addi %5, %arg1 : i32
    %7 = tpu.iota {dimensions = array<i32: 0>} : vector<16x128xi32>
    %8 = tpu.iota {dimensions = array<i32: 1>} : vector<16x128xi32>
    %c16_i32 = arith.constant 16 : i32
    %9 = arith.muli %6, %c16_i32 : i32
    %10 = vector.broadcast %9 : i32 to vector<16x128xi32>
    %11 = arith.addi %10, %7 : vector<16x128xi32>
    %c128_i32 = arith.constant 128 : i32
    %12 = vector.broadcast %c128_i32 : i32 to vector<16x128xi32>
    %13 = arith.muli %11, %12 : vector<16x128xi32>
    %14 = arith.addi %13, %8 : vector<16x128xi32>
    %cst = arith.constant 0.000000e+00 : f32
    %15 = vector.broadcast %cst : f32 to vector<16x128xf32>
    %16 = arith.cmpf ogt, %3, %15 : vector<16x128xf32>
    %c2048_i32 = arith.constant 2048 : i32
    %17 = vector.broadcast %c2048_i32 : i32 to vector<16x128xi32>
    %18 = arith.cmpi slt, %14, %17 : vector<16x128xi32>
    %19 = arith.andi %16, %18 : vector<16x128xi1>
    %cst_4 = arith.constant 1.000000e+00 : f32
    %20 = vector.broadcast %cst_4 : f32 to vector<16x128xf32>
    %21 = arith.select %19, %3, %20 : vector<16x128xi1>, vector<16x128xf32>
    %cst_5 = arith.constant 1.000000e+00 : f32
    %22 = vector.broadcast %cst_5 : f32 to vector<16x128xf32>
    %23 = arith.select %19, %4, %22 : vector<16x128xi1>, vector<16x128xf32>
    %24 = arith.subf %23, %21 : vector<16x128xf32>
    %25 = arith.mulf %21, %23 : vector<16x128xf32>
    %26 = arith.divf %24, %25 : vector<16x128xf32>
    %27 = arith.mulf %26, %26 : vector<16x128xf32>
    %cst_6 = arith.constant 0.000000e+00 : f32
    %28 = vector.broadcast %cst_6 : f32 to vector<16x128xf32>
    %29 = arith.select %19, %27, %28 : vector<16x128xi1>, vector<16x128xf32>
    %c0_7 = arith.constant 0 : index
    %c0_8 = arith.constant 0 : index
    %30 = vector.load %arg6[%c0_7, %c0_8] : memref<16x128xf32, #tpu.memory_space<vmem>>, vector<16x128xf32>
    %31 = arith.addf %30, %29 : vector<16x128xf32>
    %c0_9 = arith.constant 0 : index
    %c0_10 = arith.constant 0 : index
    %32 = vector.load %arg6[%c0_9, %c0_10] : memref<16x128xf32, #tpu.memory_space<vmem>>, vector<16x128xf32>
    tpu.vector_store %arg6[%c0_9, %c0_10], %31 {strides = array<i32>} : memref<16x128xf32, #tpu.memory_space<vmem>>, vector<16x128xf32>,
    %c0_11 = arith.constant 0 : index
    %c0_12 = arith.constant 0 : index
    %33 = vector.load %arg7[%c0_11, %c0_12] : memref<16x128xf32, #tpu.memory_space<vmem>>, vector<16x128xf32>
    %34 = arith.extui %19 : vector<16x128xi1> to vector<16x128xi32>
    %35 = arith.sitofp %34 : vector<16x128xi32> to vector<16x128xf32>
    %36 = arith.addf %33, %35 : vector<16x128xf32>
    %c0_13 = arith.constant 0 : index
    %c0_14 = arith.constant 0 : index
    %37 = vector.load %arg7[%c0_13, %c0_14] : memref<16x128xf32, #tpu.memory_space<vmem>>, vector<16x128xf32>
    tpu.vector_store %arg7[%c0_13, %c0_14], %36 {strides = array<i32>} : memref<16x128xf32, #tpu.memory_space<vmem>>, vector<16x128xf32>,
    %c0_i32_15 = arith.constant 0 : i32
    %38 = arith.cmpi eq, %arg1, %c0_i32_15 : i32
    %39 = arith.extui %38 : i1 to i32
    %c0_i32_16 = arith.constant 0 : i32
    %40 = arith.cmpi ne, %39, %c0_i32_16 : i32
    scf.if %40 {
      %c0_17 = arith.constant 0 : index
      %c0_18 = arith.constant 0 : index
      %41 = vector.load %arg6[%c0_17, %c0_18] : memref<16x128xf32, #tpu.memory_space<vmem>>, vector<16x128xf32>
      %42 = vector.shape_cast %41 : vector<16x128xf32> to vector<1x16x128xf32>
      %cst_19 = arith.constant dense<0.000000e+00> : vector<1xf32>
      %43 = vector.multi_reduction <add>, %42, %cst_19 [1, 2] : vector<1x16x128xf32> to vector<1xf32>
      %44 = vector.shape_cast %43 : vector<1xf32> to vector<1x1x1xf32>
      %45 = vector.extract %44[0, 0, 0] : f32 from vector<1x1x1xf32>
      %c0_20 = arith.constant 0 : index
      %c0_21 = arith.constant 0 : index
      %46 = vector.load %arg7[%c0_20, %c0_21] : memref<16x128xf32, #tpu.memory_space<vmem>>, vector<16x128xf32>
      %47 = vector.shape_cast %46 : vector<16x128xf32> to vector<1x16x128xf32>
      %cst_22 = arith.constant dense<0.000000e+00> : vector<1xf32>
      %48 = vector.multi_reduction <add>, %47, %cst_22 [1, 2] : vector<1x16x128xf32> to vector<1xf32>
      %49 = vector.shape_cast %48 : vector<1xf32> to vector<1x1x1xf32>
      %50 = vector.extract %49[0, 0, 0] : f32 from vector<1x1x1xf32>
      %51 = vector.broadcast %45 : f32 to vector<1x8x128xf32>
      %c0_23 = arith.constant 0 : index
      %c0_24 = arith.constant 0 : index
      %c0_25 = arith.constant 0 : index
      %52 = vector.load %arg4[%c0_23, %c0_24, %c0_25] : memref<1x8x128xf32, #tpu.memory_space<vmem>>, vector<1x8x128xf32>
      tpu.vector_store %arg4[%c0_23, %c0_24, %c0_25], %51 {strides = array<i32>} : memref<1x8x128xf32, #tpu.memory_space<vmem>>, vector<1x8x128xf32>,
      %53 = vector.broadcast %50 : f32 to vector<1x8x128xf32>
      %c0_26 = arith.constant 0 : index
      %c0_27 = arith.constant 0 : index
      %c0_28 = arith.constant 0 : index
      %54 = vector.load %arg5[%c0_26, %c0_27, %c0_28] : memref<1x8x128xf32, #tpu.memory_space<vmem>>, vector<1x8x128xf32>
      tpu.vector_store %arg5[%c0_26, %c0_27, %c0_28], %53 {strides = array<i32>} : memref<1x8x128xf32, #tpu.memory_space<vmem>>, vector<1x8x128xf32>,
    } else {
    }
    return
  }
  func.func @transform_0(%arg0: i32, %arg1: i32) -> (i32, i32) {
    %c1_i32 = arith.constant 1 : i32
    %0 = arith.muli %arg0, %c1_i32 : i32
    %1 = arith.addi %0, %arg1 : i32
    %c0_i32 = arith.constant 0 : i32
    %2 = arith.minsi %1, %c0_i32 : i32
    %c0_i32_0 = arith.constant 0 : i32
    %c0_i32_1 = arith.constant 0 : i32
    return %2, %c0_i32_0 : i32, i32
  }
  func.func @transform_1(%arg0: i32, %arg1: i32) -> (i32, i32) {
    %c1_i32 = arith.constant 1 : i32
    %0 = arith.muli %arg0, %c1_i32 : i32
    %1 = arith.addi %0, %arg1 : i32
    %c0_i32 = arith.constant 0 : i32
    %2 = arith.minsi %1, %c0_i32 : i32
    %c0_i32_0 = arith.constant 0 : i32
    %c0_i32_1 = arith.constant 0 : i32
    return %2, %c0_i32_0 : i32, i32
  }
  func.func @transform_2(%arg0: i32, %arg1: i32) -> (i32, i32, i32) {
    %c0_i32 = arith.constant 0 : i32
    %c0_i32_0 = arith.constant 0 : i32
    %c0_i32_1 = arith.constant 0 : i32
    return %arg0, %c0_i32, %c0_i32_0 : i32, i32, i32
  }
  func.func @transform_3(%arg0: i32, %arg1: i32) -> (i32, i32, i32) {
    %c0_i32 = arith.constant 0 : i32
    %c0_i32_0 = arith.constant 0 : i32
    %c0_i32_1 = arith.constant 0 : i32
    return %arg0, %c0_i32, %c0_i32_0 : i32, i32, i32
  }
}

</mosaic_0001>

<bundles_post_ra>
// kernel: tpu_custom_call.1
= control target key start
LH: loop header
LB: loop body
LE: loop exit
PB: predicated region body
PF: predicated region fallthrough
CT: control target
= control target key end

     0   :  { %9 = vsyncpa [#allocation5], 0  ;;  %s404_s0 = inlined_call_operand.hbm [shape: f32[16,128], index: 0, kind: input, shape index: {}]   ;;  %s405_s1 = inlined_call_operand.hbm [shape: f32[16,128], index: 1, kind: input, shape index: {}]   ;;  %s406_s2 = inlined_call_operand.hbm [shape: f32[1,8,128], index: 2, kind: output, shape index: {0}]   ;;  %s407_s3 = inlined_call_operand.hbm [shape: f32[1,8,128], index: 3, kind: output, shape index: {1}]  }
   0x1   :  { %10 = vsyncpa [#allocation8], 0 }
   0x2   :  { %11 = vsyncpa [#allocation6], 0 }
   0x3   :  { %12 = vsyncpa [#allocation11], 0  ;;  %s305_s12 = smov [#allocation4]   ;;  %s209_s16 = scalar_lea.hbm %s404_s0, 256 }
   0x4   :  { %s24_s13 = sshll.u32 %s305_s12, 4  ;;  %p210_p0 = scmp.ne.s32.totalorder %s404_s0, %s209_s16  ;;  %s25_s13 = int_to_ptr.vmem [resolvable:$true] %s24_s13 }
   0x5   :  { %p213_p1 = scmp.lt.u32.totalorder %s209_s16, %s404_s0 }
   0x7   :  { %p215_p2 = pnand %p213_p1, %p210_p0 }
   0x9   :  { %218 = shalt.err (!%p215_p2)
}
   0xa   :  { %s219_s21 = scalar_lea.vmem %s25_s13, 256  ;;  %p224_p4 = scmp.lt.s32.totalorder %s25_s13, %s25_s13 }
   0xb   :  { %p220_p3 = scmp.ne.s32.totalorder %s25_s13, %s219_s21  ;;  %p225_p5 = scmp.lt.s32.totalorder %s219_s21, %s219_s21 }
   0xd   :  { %p226_p6 = por %p225_p5, %p224_p4 }
   0xf   :  { %p227_p7 = pnand %p226_p6, %p220_p3 }
  0x11   :  { %230 = shalt.err (!%p227_p7)
}
  0x12   :  { %s306_s22 = smov 128   ;;  %s307_s23 = smov 8  }
  0x13   :  { %30 = dma.hbm_to_vmem [thread:$0]  %s404_s0, 256, %s25_s13, [#allocation5], %s306_s22, %s306_s22, %s307_s23  }
  0x14   :  { %s308_s26 = smov [#allocation7]   ;;  %s231_s30 = scalar_lea.hbm %s405_s1, 256 }
  0x15   :  { %s42_s27 = sshll.u32 %s308_s26, 4  ;;  %p232_p8 = scmp.ne.s32.totalorder %s405_s1, %s231_s30  ;;  %s43_s27 = int_to_ptr.vmem [resolvable:$true] %s42_s27 }
  0x16   :  { %p235_p9 = scmp.lt.u32.totalorder %s231_s30, %s405_s1 }
  0x18   :  { %p237_p10 = pnand %p235_p9, %p232_p8 }
  0x1a   :  { %240 = shalt.err (!%p237_p10)
}
  0x1b   :  { %s241_s8 = scalar_lea.vmem %s43_s27, 256  ;;  %p246_p12 = scmp.lt.s32.totalorder %s43_s27, %s43_s27 }
  0x1c   :  { %p242_p11 = scmp.ne.s32.totalorder %s43_s27, %s241_s8  ;;  %p247_p13 = scmp.lt.s32.totalorder %s241_s8, %s241_s8 }
  0x1e   :  { %p248_p0 = por %p247_p13, %p246_p12 }
  0x20   :  { %p249_p1 = pnand %p248_p0, %p242_p11 }
  0x22   :  { %252 = shalt.err (!%p249_p1)
}
  0x23   :  { %48 = dma.hbm_to_vmem [thread:$0]  %s405_s1, 256, %s43_s27, [#allocation8], %s306_s22, %s306_s22, %s307_s23  }
  0x24   :  { %297 = dma.done.wait [#allocation5], 256  }
  0x25   :  { %298 = vsyncadd [#allocation5], 4294967040 }
  0x26   :  { %299 = dma.done.wait [#allocation8], 256  }
  0x27   :  { %300 = vsyncadd [#allocation8], 4294967040  ;;  %v76_v0 = vlaneseq  ;;  %v71_v7 = vld [vmem:[#allocation7] sm:$0xff]  ;;  %v72_v8 = vld [vmem:[#allocation7 + $0x8] sm:$0xff]  ;;  %v309_v30 = vmov 0.0   ;;  %s310_s1 = smov [#allocation9]  }
  0x28   :  { %v73_v9 = vld [vmem:[#allocation4] sm:$0xff]  ;;  %vm89_vm0 = vcmp.gt.f32.partialorder %v71_v7, 0.0  ;;  %vm90_vm1 = vcmp.gt.f32.partialorder %v72_v8, 0.0  ;;  %v74_v11 = vld [vmem:[#allocation4 + $0x8] sm:$0xff]  ;;  %s164_s10 = sshll.u32 %s310_s1, 4  ;;  %s311_s12 = smov [#allocation10]   ;;  %s165_s10 = int_to_ptr.vmem [resolvable:$true] %s164_s10 }
  0x29   :  { %v77_v1 = vshrl.u32 %v76_v0, 7  ;;  %v80_v2 = vand.u32 127, %v76_v0  ;;  %s174_s13 = sshll.u32 %s311_s12, 4  ;;  %s253_s14 = scalar_lea.vmem %s165_s10, 128  ;;  %s175_s13 = int_to_ptr.vmem [resolvable:$true] %s174_s13 }
  0x2a   :  { %p254_p2 = scmp.ne.s32.totalorder %s165_s10, %s253_s14  ;;  %p258_p3 = scmp.lt.s32.totalorder %s165_s10, %s165_s10 }
  0x2b   :  { %v78_v3 = vadd.s32 8, %v77_v1  ;;  %v85_v4 = vmul.u32 128, %v77_v1  ;;  %p259_p4 = scmp.lt.s32.totalorder %s253_s14, %s253_s14 }
  0x2d   :  { %v86_v5 = vmul.u32 128, %v78_v3  ;;  %v87_v6 = vadd.s32 %v85_v4, %v80_v2  ;;  %p260_p5 = por %p259_p4, %p258_p3 }
  0x2f   :  { %v88_v10 = vadd.s32 %v86_v5, %v80_v2  ;;  %vm91_vm2 = vcmp.lt.s32.totalorder %v87_v6, 2048  ;;  %p261_p6 = pnand %p260_p5, %p254_p2 }
  0x30   :  { %vm356_vm3 = vmand %vm89_vm0, %vm91_vm2 }
  0x31   :  { %vm92_vm4 = vcmp.lt.s32.totalorder %v88_v10, 2048  ;;  %v95_v13 = vsel %vm356_vm3, %v71_v7, 1.0  ;;  %v97_v14 = vsel %vm356_vm3, %v73_v9, 1.0  ;;  %v192_v31 = vsel %vm356_vm3, 1.0, %v309_v30 }
  0x32   :  { %vm364_vm5 = vmand %vm90_vm1, %vm92_vm4  ;;  %v101_v16 = vmul.f32 %v97_v14, %v95_v13  ;;  %v99_v20 = vsub.f32 %v97_v14, %v95_v13 }
  0x33   :  { %v96_v17 = vsel %vm364_vm5, %v72_v8, 1.0  ;;  %v98_v18 = vsel %vm364_vm5, %v74_v11, 1.0  ;;  %v193_v32 = vsel %vm364_vm5, 1.0, %v309_v30 }
  0x34   :  { %v102_v19 = vmul.f32 %v98_v18, %v96_v17  ;;  %205 = vrcp.f32 %v101_v16  ;;  %v100_v21 = vsub.f32 %v98_v18, %v96_v17  ;;  %v144_v34 = vadd.f32 %v193_v32, %v192_v31 }
  0x36   :  { %207 = vrcp.f32 %v102_v19 }
  0x3e   :  { %v206_v22 = vpop.eup %205 }
  0x3f   :  { %v104_v23 = vmul.f32 %v206_v22, %v99_v20 }
  0x40   :  { %v208_v24 = vpop.eup %207 }
  0x41   :  { %v106_v25 = vmul.f32 %v208_v24, %v100_v21  ;;  %v107_v26 = vmul.f32 %v104_v23, %v104_v23 }
  0x43   :  { %v108_v27 = vmul.f32 %v106_v25, %v106_v25  ;;  %v109_v28 = vsel %vm356_vm3, %v107_v26, 0.0 }
  0x45   :  { %v110_v29 = vsel %vm364_vm5, %v108_v27, 0.0 }
  0x46   :  { %v132_v33 = vadd.f32 %v110_v29, %v109_v28 }
  0x48   :  { %133 = vadd.xlane.f32.xlu0 %v132_v33 }
  0x4c   :  { %145 = vadd.xlane.f32.xlu0 %v144_v34 }
  0xd5   :  { %v134_v35 = vpop.xlane.xlu0 %133 }
  0xd6   :  { %v135_v36 = vrot.slane %v134_v35, 4 }
  0xd8   :  { %v136_v37 = vadd.f32 %v135_v36, %v134_v35 }
  0xd9   :  { %v146_v38 = vpop.xlane.xlu0 %145 }
  0xda   :  { %v137_v39 = vrot.slane %v136_v37, 2  ;;  %v147_v40 = vrot.slane %v146_v38, 4 }
  0xdc   :  { %v148_v41 = vadd.f32 %v147_v40, %v146_v38  ;;  %v138_v42 = vadd.f32 %v137_v39, %v136_v37 }
  0xde   :  { %v149_v43 = vrot.slane %v148_v41, 2  ;;  %v139_v44 = vrot.slane %v138_v42, 1 }
  0xe0   :  { %v150_v45 = vadd.f32 %v149_v43, %v148_v41  ;;  %v140_v46 = vadd.f32 %v139_v44, %v138_v42 }
  0xe2   :  { %194 = vpush %v140_v46  ;;  %v151_v47 = vrot.slane %v150_v45, 1 }
  0xe4   :  { %v152_v48 = vadd.f32 %v151_v47, %v150_v45 }
  0xe6   :  { %196 = vpush %v152_v48 }
 0x113   :  { %s195_s11 = spop %194 }
 0x114   :  { %v154_v49 = vstv %s195_s11 }
 0x115   :  { %155 = vst [vmem:[#allocation9] sm:$0xff] %v154_v49 }
 0x116   :  { %264 = shalt.err (!%p261_p6)
}
 0x117   :  { %s265_s17 = scalar_lea.hbm %s406_s2, 128 }
 0x118   :  { %p266_p7 = scmp.ne.s32.totalorder %s406_s2, %s265_s17  ;;  %p269_p8 = scmp.lt.u32.totalorder %s265_s17, %s406_s2 }
 0x11a   :  { %p271_p9 = pnand %p269_p8, %p266_p7 }
 0x11c   :  { %274 = shalt.err (!%p271_p9)
}
 0x11d   :  { %167 = dma.vmem_to_hbm [thread:$0]  %s165_s10, 128, %s406_s2, [#allocation6]  }
 0x11e   :  { %s197_s24 = spop %196  ;;  %s275_s25 = scalar_lea.vmem %s175_s13, 128 }
 0x11f   :  { %v156_v50 = vstv %s197_s24  ;;  %p276_p10 = scmp.ne.s32.totalorder %s175_s13, %s275_s25  ;;  %p280_p11 = scmp.lt.s32.totalorder %s175_s13, %s175_s13 }
 0x120   :  { %157 = vst [vmem:[#allocation10] sm:$0xff] %v156_v50  ;;  %p281_p12 = scmp.lt.s32.totalorder %s275_s25, %s275_s25 }
 0x122   :  { %p282_p13 = por %p281_p12, %p280_p11 }
 0x124   :  { %p283_p0 = pnand %p282_p13, %p276_p10 }
 0x126   :  { %286 = shalt.err (!%p283_p0)
}
 0x127   :  { %s287_s28 = scalar_lea.hbm %s407_s3, 128 }
 0x128   :  { %p288_p1 = scmp.ne.s32.totalorder %s407_s3, %s287_s28  ;;  %p291_p2 = scmp.lt.u32.totalorder %s287_s28, %s407_s3 }
 0x12a   :  { %p293_p3 = pnand %p291_p2, %p288_p1 }
 0x12c   :  { %296 = shalt.err (!%p293_p3)
}
 0x12d   :  { %177 = dma.vmem_to_hbm [thread:$0]  %s175_s13, 128, %s407_s3, [#allocation11]  }
 0x12e   :  { %301 = dma.done.wait [#allocation6], 128  }
 0x12f   :  { %302 = vsyncadd [#allocation6], 4294967168 }
 0x130   :  { %303 = dma.done.wait [#allocation11], 128  }
 0x131   :  { %304 = vsyncadd [#allocation11], 4294967168 }
 0x132   :  { %184 = vsyncpa [#allocation5], 1 }
 0x133   :  { %185 = vsyncpa [#allocation8], 1 }
 0x134   :  { %186 = vsyncpa [#allocation6], 1 }
 0x135   :  { %187 = vsyncpa [#allocation11], 1 }

</bundles_post_ra>
